<compile_context>
chip_gen: v7x
topology: tpu7x:2x2x1
jax: 0.10.0
libtpu: 0.0.40
codegen_flags: <defaults>
</compile_context>

<pallas_src>
import warnings

import numpy as np
import jax
import jax.numpy as jnp
from jax import lax
from jax.experimental import pallas as pl
from jax.experimental.pallas import tpu as pltpu


def _vmem_budget_bytes():
    """Generation-aware VMEM budget (~70% of per-core capacity)."""
    try:
        cap = int(pltpu.get_tpu_info().vmem_capacity_bytes)
    except Exception:  # pragma: no cover - conservative fallback (v7x per-core)
        cap = 64 << 20
    return cap, max(int(0.7 * cap), 16 << 20)


def _choose_strip_rows(H2, W2, max_m):
    """Largest strip height TH with H2 % TH == 0 and TH*W2 a multiple of 128
    (lane-dense flat output block) that fits the VMEM-derived row budget."""
    divs = [th for th in range(1, H2 + 1) if H2 % th == 0]
    dense = [th for th in divs if (th * W2) % 128 == 0]
    if dense:
        fitting = [th for th in dense if th * W2 <= max_m]
        return max(fitting) if fitting else min(dense)
    warnings.warn(
        "DecodingModule kernel: no strip height gives a lane-dense "
        "(128-multiple) flat output block for W2=%d; falling back to a "
        "whole-image block (lane-masked output stores)." % W2)
    return H2


def decoding_module_forward(inner_nchw, outer_nchw, w_hwio, bias):
    """Forward pass matching the PyTorch DecodingModule.

    inner_nchw : (N, Ci, H, W)        float32 (or bfloat16)
    outer_nchw : (N, Co, 2H, 2W)
    w_hwio     : (3, 3, Ci + Co, Co)  conv weight, HWIO
    bias       : (Co,)
    returns    : (N, Co, 2H, 2W)      NCHW, like PyTorch
    """
    N, Ci, H, W = inner_nchw.shape
    _, Co, H2, W2 = outer_nchw.shape
    assert H2 == 2 * H and W2 == 2 * W
    Cin = Ci + Co
    Cout = bias.shape[0]
    assert w_hwio.shape == (3, 3, Cin, Cout)
    cdt = inner_nchw.dtype
    isz = jnp.dtype(cdt).itemsize

    K = 9 * Cin                       # real im2col depth
    Kp = ((K + 7) // 8) * 8           # sublane-aligned depth (no bias lane)
    L = (H2 + 2) * W2 + 2             # flat padded length per (n, c)

    # ---- generation-aware strip sizing ------------------------------------
    vmem_cap, vmem_budget = _vmem_budget_bytes()
    fixed = (2 * Cin * L + 2 * Cout * Kp) * isz + 2 * Cout * 4 + (2 << 20)
    per_m = (Kp + Cin + 2 * Cout + 4) * isz       # a_ref + strip + out(x2) + mask(x2)
    max_m_budget = max((vmem_budget - fixed) // per_m, 0)
    soft_cap = 1024 if vmem_cap >= (96 << 20) else 512
    max_m = min(max_m_budget, soft_cap)
    if H2 * W2 <= max_m_budget and H2 * W2 * per_m <= (8 << 20):
        max_m = max(max_m, H2 * W2)               # small image: one strip per batch
    max_m = max(max_m, W2)

    TH = _choose_strip_rows(H2, W2, max_m)        # output rows per strip
    S = H2 // TH                                  # number of strips
    M = TH * W2                                   # flat output columns per strip
    LS = M + 2 * W2 + 2                           # halo'd flat strip length

    # ---- wrapper glue (pure layout, done once by XLA) ----------------------
    # Upsample + channel-concat + row-pad + flatten: xflat[n, c, 1+(r+1)*W2+x]
    # holds the conv input at (row r, col x); rows -1 and H2 are zero padding,
    # plus one zero guard element at each end of the flat axis.
    up = jnp.repeat(jnp.repeat(inner_nchw, 2, axis=2), 2, axis=3)       # (N,Ci,H2,W2)
    xcat = jnp.concatenate([up, outer_nchw.astype(cdt)], axis=1)        # (N,Cin,H2,W2)
    xrow = jnp.pad(xcat.astype(cdt), ((0, 0), (0, 0), (1, 1), (0, 0)))  # (N,Cin,H2+2,W2)
    xflat = jnp.pad(xrow.reshape(N, Cin, (H2 + 2) * W2),
                    ((0, 0), (0, 0), (1, 1)))                           # (N,Cin,L)

    # Packed weight slab (Cout, Kp): column (dy*3+dx)*Cin + c = w[dy,dx,c,:].
    w_k = w_hwio.reshape(K, Cout).astype(cdt)                           # (K, Cout)
    wt = jnp.zeros((Cout, Kp), cdt).at[:, :K].set(jnp.transpose(w_k))   # (Cout, Kp)

    # f32 bias for the VPU epilogue.
    b2 = bias.astype(jnp.float32).reshape(Cout, 1)

    # 0/1 edge masks (period W2 along the flat axis): row 0 zeros x_out == 0
    # (dx = 0 taps), row 1 zeros x_out == W2-1 (dx = 2 taps).
    col = np.arange(M) % W2
    mask = jnp.asarray(np.stack([(col != 0), (col != W2 - 1)], axis=0)
                       .astype(np.float32), dtype=cdt)                  # (2, M)

    def kernel(x_ref, wt_ref, b_ref, mask_ref, out_ref, strip_ref, a_ref):
        # ---- pull the halo'd flat strip for this step into VMEM scratch ----
        if S == 1:
            base = 0
        else:
            base = pl.program_id(1) * M
            if M % 128 == 0:
                base = pl.multiple_of(base, 128)
        strip_ref[...] = x_ref[0, :, pl.ds(base, LS)]

        # Keep the tiny K..Kp tail defined (garbage * 0-weight would still NaN).
        if Kp > K:
            a_ref[K:Kp, :] = jnp.zeros((Kp - K, M), dtype=a_ref.dtype)

        m_left = mask_ref[0:1, :]     # zero where x_out == 0      (dx == 0 taps)
        m_right = mask_ref[1:2, :]    # zero where x_out == W2 - 1 (dx == 2 taps)

        # ---- im2col: 9 lane-dense band stores into the (Kp, M) scratch -----
        for t in range(9):
            dy, dx = t // 3, t % 3
            off = dy * W2 + dx                          # static lane offset
            band = strip_ref[:, off:off + M]            # (Cin, M), contiguous
            if dx == 0:
                band = band * m_left
            elif dx == 2:
                band = band * m_right
            a_ref[t * Cin:(t + 1) * Cin, :] = band

        # ---- single MXU matmul: (Cout,Kp) x (Kp,M) -> (Cout,M), f32 acc ----
        res = jnp.dot(wt_ref[...], a_ref[...],
                      preferred_element_type=jnp.float32)
        # f32 bias add + ReLU on the VPU; lane-dense store of the flat block.
        out_ref[0] = jnp.maximum(res + b_ref[...], 0.0).astype(out_ref.dtype)

    flops = int(2 * N * S * Cout * Kp * M)
    bytes_accessed = int((N * Cin * L + Cout * Kp + 2 * M
                          + N * Cout * H2 * W2) * isz + Cout * 4)

    out_flat = pl.pallas_call(
        kernel,
        out_shape=jax.ShapeDtypeStruct((N, Cout, H2 * W2), cdt),
        grid_spec=pltpu.PrefetchScalarGridSpec(
            num_scalar_prefetch=0,
            grid=(N, S),
            in_specs=[
                pl.BlockSpec((1, Cin, L), lambda n, s: (n, 0, 0)),
                pl.BlockSpec((Cout, Kp), lambda n, s: (0, 0)),
                pl.BlockSpec((Cout, 1), lambda n, s: (0, 0)),
                pl.BlockSpec((2, M), lambda n, s: (0, 0)),
            ],
            out_specs=pl.BlockSpec((1, Cout, M), lambda n, s: (n, 0, s)),
            scratch_shapes=[pltpu.VMEM((Cin, LS), cdt),   # halo'd flat strip
                            pltpu.VMEM((Kp, M), cdt)],    # im2col slab (K on sublanes)
        ),
        compiler_params=pltpu.CompilerParams(
            dimension_semantics=("parallel", "parallel"),
            vmem_limit_bytes=int(vmem_budget)),
        cost_estimate=pl.CostEstimate(
            flops=flops, transcendentals=0, bytes_accessed=bytes_accessed),
    )(xflat, wt, b2, mask)

    # (N, Cout, H2*W2) -> NCHW: free metadata reshape, no transpose.
    return out_flat.reshape(N, Cout, H2, W2)


def _reference_forward(inner_nchw, outer_nchw, w_hwio, bias):
    """Pure-JAX reference (same math as the PyTorch module)."""
    inner = jnp.transpose(inner_nchw, (0, 2, 3, 1))
    outer = jnp.transpose(outer_nchw, (0, 2, 3, 1))
    up = jnp.repeat(jnp.repeat(inner, 2, axis=1), 2, axis=2)
    x = jnp.concatenate([up, outer], axis=-1)
    y = lax.conv_general_dilated(
        x, w_hwio, window_strides=(1, 1), padding="SAME",
        dimension_numbers=("NHWC", "HWIO", "NHWC"))
    y = jnp.maximum(y + bias[None, None, None, :], 0.0)
    return jnp.transpose(y, (0, 3, 1, 2))


if __name__ == "__main__":
    # batch=2, inner_channels=8, outer_channels=4,
    # inner spatial 8x8 -> outer/output spatial 16x16
    N, Ci, Co = 2, 8, 4
    H, W = 8, 8

    key = jax.random.PRNGKey(0)
    k1, k2, k3, k4 = jax.random.split(key, 4)
    inner_input = jax.random.normal(k1, (N, Ci, H, W), dtype=jnp.float32)
    outer_input = jax.random.normal(k2, (N, Co, 2 * H, 2 * W), dtype=jnp.float32)

    # processing_module: Conv2d(Ci+Co -> Co, kernel 3, padding 1) + ReLU
    w_hwio = 0.05 * jax.random.normal(k3, (3, 3, Ci + Co, Co), dtype=jnp.float32)
    bias = 0.1 * jax.random.normal(k4, (Co,), dtype=jnp.float32)

    out = decoding_module_forward(inner_input, outer_input, w_hwio, bias)
    out = jax.block_until_ready(out)

    ref = _reference_forward(inner_input, outer_input, w_hwio, bias)
    np.testing.assert_allclose(np.asarray(out), np.asarray(ref),
                               rtol=1e-4, atol=1e-4)
    assert out.shape == (N, Co, 2 * H, 2 * W)
    print("KERNEL_OK")
</pallas_src>

<mosaic_0001>
module attributes {stable_mosaic.version = 11 : i64} {
  func.func @kernel(%arg0: i32, %arg1: i32, %arg2: memref<1x12x290xf32, #tpu.memory_space<vmem>>, %arg3: memref<4x112xf32, #tpu.memory_space<vmem>>, %arg4: memref<4x1xf32, #tpu.memory_space<vmem>>, %arg5: memref<2x256xf32, #tpu.memory_space<vmem>>, %arg6: memref<1x4x256xf32, #tpu.memory_space<vmem>>, %arg7: memref<12x290xf32, #tpu.memory_space<vmem>>, %arg8: memref<112x256xf32, #tpu.memory_space<vmem>>) attributes {dimension_semantics = [#tpu.dimension_semantics<parallel>, #tpu.dimension_semantics<parallel>], iteration_bounds = array<i64: 2, 1>, scalar_prefetch = 0 : i64, scratch_operands = 2 : i64, tpu.core_type = #tpu.core_type<tc>, window_params = [{transform_indices = @transform_0, window_bounds = array<i64: 1, 12, 290>}, {pipeline_mode = #tpu.pipeline_mode<synchronous>, transform_indices = @transform_1, window_bounds = array<i64: 4, 112>}, {pipeline_mode = #tpu.pipeline_mode<synchronous>, transform_indices = @transform_2, window_bounds = array<i64: 4, 1>}, {pipeline_mode = #tpu.pipeline_mode<synchronous>, transform_indices = @transform_3, window_bounds = array<i64: 2, 256>}, {transform_indices = @transform_4, window_bounds = array<i64: 1, 4, 256>}]} {
    %c0 = arith.constant 0 : index
    %c0_0 = arith.constant 0 : index
    %c0_1 = arith.constant 0 : index
    %0 = vector.load %arg2[%c0, %c0_0, %c0_1] : memref<1x12x290xf32, #tpu.memory_space<vmem>>, vector<1x12x290xf32>
    %1 = vector.shape_cast %0 : vector<1x12x290xf32> to vector<12x290xf32>
    %c0_2 = arith.constant 0 : index
    %c0_3 = arith.constant 0 : index
    %2 = vector.load %arg7[%c0_2, %c0_3] : memref<12x290xf32, #tpu.memory_space<vmem>>, vector<12x290xf32>
    tpu.vector_store %arg7[%c0_2, %c0_3], %1 {strides = array<i32>} : memref<12x290xf32, #tpu.memory_space<vmem>>, vector<12x290xf32>,
    %cst = arith.constant 0.000000e+00 : f32
    %3 = vector.broadcast %cst : f32 to vector<4x256xf32>
    %c108 = arith.constant 108 : index
    %c0_4 = arith.constant 0 : index
    %4 = vector.load %arg8[%c108, %c0_4] : memref<112x256xf32, #tpu.memory_space<vmem>>, vector<4x256xf32>
    tpu.vector_store %arg8[%c108, %c0_4], %3 {strides = array<i32>} : memref<112x256xf32, #tpu.memory_space<vmem>>, vector<4x256xf32>,
    %c0_5 = arith.constant 0 : index
    %c0_6 = arith.constant 0 : index
    %5 = vector.load %arg5[%c0_5, %c0_6] : memref<2x256xf32, #tpu.memory_space<vmem>>, vector<1x256xf32>
    %c1 = arith.constant 1 : index
    %c0_7 = arith.constant 0 : index
    %6 = vector.load %arg5[%c1, %c0_7] : memref<2x256xf32, #tpu.memory_space<vmem>>, vector<1x256xf32>
    %c0_8 = arith.constant 0 : index
    %c0_9 = arith.constant 0 : index
    %7 = vector.load %arg7[%c0_8, %c0_9] : memref<12x290xf32, #tpu.memory_space<vmem>>, vector<12x256xf32>
    %8 = vector.broadcast %5 : vector<1x256xf32> to vector<12x256xf32>
    %9 = arith.mulf %7, %8 : vector<12x256xf32>
    %c0_10 = arith.constant 0 : index
    %c0_11 = arith.constant 0 : index
    %10 = vector.load %arg8[%c0_10, %c0_11] : memref<112x256xf32, #tpu.memory_space<vmem>>, vector<12x256xf32>
    tpu.vector_store %arg8[%c0_10, %c0_11], %9 {strides = array<i32>} : memref<112x256xf32, #tpu.memory_space<vmem>>, vector<12x256xf32>,
    %c0_12 = arith.constant 0 : index
    %c1_13 = arith.constant 1 : index
    %11 = vector.load %arg7[%c0_12, %c1_13] : memref<12x290xf32, #tpu.memory_space<vmem>>, vector<12x256xf32>
    %c12 = arith.constant 12 : index
    %c0_14 = arith.constant 0 : index
    %12 = vector.load %arg8[%c12, %c0_14] : memref<112x256xf32, #tpu.memory_space<vmem>>, vector<12x256xf32>
    tpu.vector_store %arg8[%c12, %c0_14], %11 {strides = array<i32>} : memref<112x256xf32, #tpu.memory_space<vmem>>, vector<12x256xf32>,
    %c0_15 = arith.constant 0 : index
    %c2 = arith.constant 2 : index
    %13 = vector.load %arg7[%c0_15, %c2] : memref<12x290xf32, #tpu.memory_space<vmem>>, vector<12x256xf32>
    %14 = vector.broadcast %6 : vector<1x256xf32> to vector<12x256xf32>
    %15 = arith.mulf %13, %14 : vector<12x256xf32>
    %c24 = arith.constant 24 : index
    %c0_16 = arith.constant 0 : index
    %16 = vector.load %arg8[%c24, %c0_16] : memref<112x256xf32, #tpu.memory_space<vmem>>, vector<12x256xf32>
    tpu.vector_store %arg8[%c24, %c0_16], %15 {strides = array<i32>} : memref<112x256xf32, #tpu.memory_space<vmem>>, vector<12x256xf32>,
    %c0_17 = arith.constant 0 : index
    %c16 = arith.constant 16 : index
    %17 = vector.load %arg7[%c0_17, %c16] : memref<12x290xf32, #tpu.memory_space<vmem>>, vector<12x256xf32>
    %18 = vector.broadcast %5 : vector<1x256xf32> to vector<12x256xf32>
    %19 = arith.mulf %17, %18 : vector<12x256xf32>
    %c36 = arith.constant 36 : index
    %c0_18 = arith.constant 0 : index
    %20 = vector.load %arg8[%c36, %c0_18] : memref<112x256xf32, #tpu.memory_space<vmem>>, vector<12x256xf32>
    tpu.vector_store %arg8[%c36, %c0_18], %19 {strides = array<i32>} : memref<112x256xf32, #tpu.memory_space<vmem>>, vector<12x256xf32>,
    %c0_19 = arith.constant 0 : index
    %c17 = arith.constant 17 : index
    %21 = vector.load %arg7[%c0_19, %c17] : memref<12x290xf32, #tpu.memory_space<vmem>>, vector<12x256xf32>
    %c48 = arith.constant 48 : index
    %c0_20 = arith.constant 0 : index
    %22 = vector.load %arg8[%c48, %c0_20] : memref<112x256xf32, #tpu.memory_space<vmem>>, vector<12x256xf32>
    tpu.vector_store %arg8[%c48, %c0_20], %21 {strides = array<i32>} : memref<112x256xf32, #tpu.memory_space<vmem>>, vector<12x256xf32>,
    %c0_21 = arith.constant 0 : index
    %c18 = arith.constant 18 : index
    %23 = vector.load %arg7[%c0_21, %c18] : memref<12x290xf32, #tpu.memory_space<vmem>>, vector<12x256xf32>
    %24 = vector.broadcast %6 : vector<1x256xf32> to vector<12x256xf32>
    %25 = arith.mulf %23, %24 : vector<12x256xf32>
    %c60 = arith.constant 60 : index
    %c0_22 = arith.constant 0 : index
    %26 = vector.load %arg8[%c60, %c0_22] : memref<112x256xf32, #tpu.memory_space<vmem>>, vector<12x256xf32>
    tpu.vector_store %arg8[%c60, %c0_22], %25 {strides = array<i32>} : memref<112x256xf32, #tpu.memory_space<vmem>>, vector<12x256xf32>,
    %c0_23 = arith.constant 0 : index
    %c32 = arith.constant 32 : index
    %27 = vector.load %arg7[%c0_23, %c32] : memref<12x290xf32, #tpu.memory_space<vmem>>, vector<12x256xf32>
    %28 = vector.broadcast %5 : vector<1x256xf32> to vector<12x256xf32>
    %29 = arith.mulf %27, %28 : vector<12x256xf32>
    %c72 = arith.constant 72 : index
    %c0_24 = arith.constant 0 : index
    %30 = vector.load %arg8[%c72, %c0_24] : memref<112x256xf32, #tpu.memory_space<vmem>>, vector<12x256xf32>
    tpu.vector_store %arg8[%c72, %c0_24], %29 {strides = array<i32>} : memref<112x256xf32, #tpu.memory_space<vmem>>, vector<12x256xf32>,
    %c0_25 = arith.constant 0 : index
    %c33 = arith.constant 33 : index
    %31 = vector.load %arg7[%c0_25, %c33] : memref<12x290xf32, #tpu.memory_space<vmem>>, vector<12x256xf32>
    %c84 = arith.constant 84 : index
    %c0_26 = arith.constant 0 : index
    %32 = vector.load %arg8[%c84, %c0_26] : memref<112x256xf32, #tpu.memory_space<vmem>>, vector<12x256xf32>
    tpu.vector_store %arg8[%c84, %c0_26], %31 {strides = array<i32>} : memref<112x256xf32, #tpu.memory_space<vmem>>, vector<12x256xf32>,
    %c0_27 = arith.constant 0 : index
    %c34 = arith.constant 34 : index
    %33 = vector.load %arg7[%c0_27, %c34] : memref<12x290xf32, #tpu.memory_space<vmem>>, vector<12x256xf32>
    %34 = vector.broadcast %6 : vector<1x256xf32> to vector<12x256xf32>
    %35 = arith.mulf %33, %34 : vector<12x256xf32>
    %c96 = arith.constant 96 : index
    %c0_28 = arith.constant 0 : index
    %36 = vector.load %arg8[%c96, %c0_28] : memref<112x256xf32, #tpu.memory_space<vmem>>, vector<12x256xf32>
    tpu.vector_store %arg8[%c96, %c0_28], %35 {strides = array<i32>} : memref<112x256xf32, #tpu.memory_space<vmem>>, vector<12x256xf32>,
    %c0_29 = arith.constant 0 : index
    %c0_30 = arith.constant 0 : index
    %37 = vector.load %arg3[%c0_29, %c0_30] : memref<4x112xf32, #tpu.memory_space<vmem>>, vector<4x112xf32>
    %c0_31 = arith.constant 0 : index
    %c0_32 = arith.constant 0 : index
    %38 = vector.load %arg8[%c0_31, %c0_32] : memref<112x256xf32, #tpu.memory_space<vmem>>, vector<112x256xf32>
    %cst_33 = arith.constant dense<0.000000e+00> : vector<4x256xf32>
    %39 = tpu.matmul %37, %38, %cst_33 {dimension_numbers = #tpu.dot_dimension_numbers<[1], [0], [0], [1], [0, 0, 1, 1], [], []>} : vector<4x112xf32>, vector<112x256xf32>, vector<4x256xf32> -> vector<4x256xf32>
    %c0_34 = arith.constant 0 : index
    %c0_35 = arith.constant 0 : index
    %40 = vector.load %arg4[%c0_34, %c0_35] : memref<4x1xf32, #tpu.memory_space<vmem>>, vector<4x1xf32>
    %41 = vector.broadcast %40 : vector<4x1xf32> to vector<4x256xf32>
    %42 = arith.addf %39, %41 : vector<4x256xf32>
    %cst_36 = arith.constant 0.000000e+00 : f32
    %43 = vector.broadcast %cst_36 : f32 to vector<4x256xf32>
    %44 = arith.maximumf %42, %43 : vector<4x256xf32>
    %c0_37 = arith.constant 0 : index
    %c0_38 = arith.constant 0 : index
    %c0_39 = arith.constant 0 : index
    %45 = vector.load %arg6[%c0_37, %c0_38, %c0_39] : memref<1x4x256xf32, #tpu.memory_space<vmem>>, vector<1x4x256xf32>
    %46 = vector.shape_cast %45 : vector<1x4x256xf32> to vector<4x256xf32>
    %47 = vector.shape_cast %44 : vector<4x256xf32> to vector<1x4x256xf32>
    tpu.vector_store %arg6[%c0_37, %c0_38, %c0_39], %47 {strides = array<i32>} : memref<1x4x256xf32, #tpu.memory_space<vmem>>, vector<1x4x256xf32>,
    return
  }
  func.func @transform_0(%arg0: i32, %arg1: i32) -> (i32, i32, i32) {
    %c0_i32 = arith.constant 0 : i32
    %c0_i32_0 = arith.constant 0 : i32
    %c0_i32_1 = arith.constant 0 : i32
    return %arg0, %c0_i32, %c0_i32_0 : i32, i32, i32
  }
  func.func @transform_1(%arg0: i32, %arg1: i32) -> (i32, i32) {
    %c0_i32 = arith.constant 0 : i32
    %c0_i32_0 = arith.constant 0 : i32
    %c0_i32_1 = arith.constant 0 : i32
    return %c0_i32, %c0_i32_0 : i32, i32
  }
  func.func @transform_2(%arg0: i32, %arg1: i32) -> (i32, i32) {
    %c0_i32 = arith.constant 0 : i32
    %c0_i32_0 = arith.constant 0 : i32
    %c0_i32_1 = arith.constant 0 : i32
    return %c0_i32, %c0_i32_0 : i32, i32
  }
  func.func @transform_3(%arg0: i32, %arg1: i32) -> (i32, i32) {
    %c0_i32 = arith.constant 0 : i32
    %c0_i32_0 = arith.constant 0 : i32
    %c0_i32_1 = arith.constant 0 : i32
    return %c0_i32, %c0_i32_0 : i32, i32
  }
  func.func @transform_4(%arg0: i32, %arg1: i32) -> (i32, i32, i32) {
    %c0_i32 = arith.constant 0 : i32
    %c0_i32_0 = arith.constant 0 : i32
    return %arg0, %c0_i32, %arg1 : i32, i32, i32
  }
}

</mosaic_0001>

<bundles_post_ra>
// kernel: tpu_custom_call.1
= control target key start
LH: loop header
LB: loop body
LE: loop exit
PB: predicated region body
PF: predicated region fallthrough
CT: control target
= control target key end

     0   :  { %9 = vsyncpa [#allocation5], 0  ;;  %s1397_s0 = inlined_call_operand.vmem [shape: f32[2,12,290], index: 0, kind: input, shape index: {}]   ;;  %s1398_s1 = inlined_call_operand.vmem [shape: f32[4,112], index: 1, kind: input, shape index: {}]   ;;  %s1399_s2 = inlined_call_operand.vmem [shape: f32[4,1], index: 2, kind: input, shape index: {}]   ;;  %s1400_s3 = inlined_call_operand.vmem [shape: f32[2,256], index: 3, kind: input, shape index: {}]   ;;  %s1401_s4 = inlined_call_operand.hbm [shape: f32[2,4,256], index: 4, kind: output, shape index: {}]  }
   0x1   :  { %11 = vsyncpa [#allocation5 + $0x1], 0  ;;  %s1108_s15 = smov 0   ;;  %s1110_s16 = smov 0  }
   0x2   :  { %s1112_s17 = smov 0   ;;  %s1114_s18 = smov 0  }
   0x3   :  { %s1116_s19 = smov 0   ;;  %s1118_s20 = smov 0  }
   0x4 LB: > { %s872_s21 = sadd.s32 4294967295, %s1065_s20   ;;  %s873_s22 = sadd.s32 4294967294, %s1065_s20   ;;  %s1065_s20 = sphi %s1118_s20, %s17_s20   ;;  %s1061_s19 = sphi %s1116_s19, %s1408_s19   ;;  %s1057_s18 = sphi %s1114_s18, %s1407_s18   ;;  %s1053_s17 = sphi %s1112_s17, %s1406_s17   ;;  %s1049_s16 = sphi %s1110_s16, %s1405_s16   ;;  %s1045_s15 = sphi %s1108_s15, %s1404_s15  }
   0x5   : > { %s29_s23 = sadd.s32 1, %s1061_s19  ;;  %s127_s24 = sadd.s32 1, %s1053_s17 }
   0x6   : > { %p31_p0 = scmp.ge.s32.totalorder %s29_s23, 2  ;;  %p137_p1 = scmp.ne.s32.totalorder %s1053_s17, %s1049_s16 }
   0x7   : > { %p138_p2 = scmp.eq.s32.totalorder %s872_s21, 1  ;;  %p143_p3 = scmp.ne.s32.totalorder %s1049_s16, %s1045_s15 }
   0x8   : > { %s1410_s23 = smov (%p31_p0, %s29_s23), 0  ;;  %p144_p5 = scmp.eq.s32.totalorder %s873_s22, 1 }
   0x9   : > { %p1148_p4 = por %p138_p2, %p137_p1  ;;  %s122_s26 = ssub.s32 %s1061_s19, %s1410_s23 }
   0xa   : > { %p876_p6 = scmp.ge.s32.totalorder %s1065_s20, 1  ;;  %p125_p7 = scmp.eq.s32.totalorder %s122_s26, 0 }
   0xb   : > { %p1155_p8 = por %p144_p5, %p143_p3  ;;  %p179_p9 = scmp.lt.s32.totalorder %s1065_s20, 3 }
   0xc   : > { %s1161_s28 = scalar_select %p125_p7, %s1053_s17, %s127_s24  }
   0xd   : > { %p180_p10 = pnand %p876_p6, %p179_p9 }
   0xe   : > { %v235_v0 = vlaneseq (!%p180_p10)  ;;  %p205_p11 = scmp.lt.s32.totalorder (!%p180_p10), %s1057_s18, 1  ;;  %v879_v1 = vld [vmem:[%s1400_s3 + $0x1] ss:$2 sm:$0x3] (!%p180_p10)  ;;  %vm219_vm0 = vcmask (!%p180_p10), 277504   ;;  %s1067_s12 = smov (!%p180_p10), 2  }
   0xf   : > { %183 = sbr.rel (%p180_p10) target bundleno = 569 (0x239), region = 36  ;;  %v227_v3 = vld [vmem:[%s1400_s3] ss:$2 sm:$0x3] (!%p180_p10)  ;;  %s1068_s13 = smov (!%p180_p10), 16   ;;  %vm223_vm1 = vcmask (!%p180_p10), 273408  }
  0x10   : > { %v236_v2 = vshrl.u32 (!%p180_p10), %v235_v0, 7  ;;  %s1069_s14 = smov (!%p180_p10), 18   ;;  %s1070_s21 = smov (!%p180_p10), 32   ;;  %vm265_vm2 = vcmask (!%p180_p10), 1043456   ;;  %vm319_vm3 = vcmask (!%p180_p10), 15360   ;;  %vm287_vm4 = vcmask (!%p180_p10), 1039360  }
  0x11   : > { %s1071_s22 = smov (!%p180_p10), 34   ;;  %s1072_s24 = smov (!%p180_p10), 127   ;;  %vm530_vm5 = vcmask (!%p180_p10), 261120   ;;  %vm371_vm6 = vcmask (!%p180_p10), 130048   ;;  %vm446_vm7 = vcmask (!%p180_p10), 908288   ;;  %vm469_vm8 = vcmask (!%p180_p10), 146432  }
  0x12   : > { %v237_v4 = vsub.s32 (!%p180_p10), 0, %v236_v2  ;;  %v241_v5 = vsub.s32 (!%p180_p10), 1, %v236_v2  ;;  %s1073_s26 = smov (!%p180_p10), 111   ;;  %s1074_s29 = smov (!%p180_p10), 95   ;;  %vm605_vm9 = vcmask (!%p180_p10), 777216   ;;  %vm348_vm10 = vcmask (!%p180_p10), 1031168  }
  0x13   : > { %s1075_s30 = smov (!%p180_p10), 126   ;;  %s1076_s5 = smov (!%p180_p10), 96   ;;  %vm559_vm11 = vcmask (!%p180_p10), 785408   ;;  %vm409_vm12 = vcmask (!%p180_p10), 916480   ;;  %vm507_vm13 = vcmask (!%p180_p10), 900096   ;;  %vm656_vm14 = vcmask (!%p180_p10), 769024  }
  0x14   : > { %v310_v6 = vrot.slane (!%p180_p10), %v879_v1, %v237_v4  ;;  %v238_v7 = vrot.slane (!%p180_p10), %v227_v3, %v237_v4  ;;  %v314_v10 = vrot.slane (!%p180_p10), %v879_v1, %v241_v5  ;;  %v242_v11 = vrot.slane (!%p180_p10), %v227_v3, %v241_v5  ;;  %s1077_s6 = smov (!%p180_p10), 112  }
  0x16   : > { %s206_s7 = scalar_select %p205_p11, %s1057_s18, 1  ;;  %315 = vrot.lane.b32.xlu0 %v310_v6, %s1067_s12  ;;  %367 = vrot.lane.b32.xlu1 %v238_v7, %s1068_s13 }
  0x18   : > { %s915_s8 = smul.u32 48, %s206_s7  ;;  %s1078_s7 = smov 110  }
  0x1a   : > { %s209_s11 = scalar_lea.vmem %s1397_s0, %s915_s8  ;;  %317 = vrot.lane.b32.xlu0 %v314_v10, %s1067_s12  ;;  %369 = vrot.lane.b32.xlu1 %v242_v11, %s1068_s13  ;;  %s1079_s8 = smov 94  }
  0x1b   : > { %v1174_v8 = vld [vmem:[%s209_s11] sm:$0xff]  ;;  %v214_v9 = vld [vmem:[%s209_s11 + $0x18] sm:$0xf]  ;;  %v1179_v13 = vld [vmem:[%s209_s11 + $0x8] sm:$0xff]  ;;  %s202_s13 = sand.u32 1, %s1049_s16  }
  0x1c   : > { %221 = vst [vmem:[#allocation2 + $0x18] sm:$0xf] %v214_v9  ;;  %v1177_v12 = vmul.f32 %v238_v7, %v1174_v8  ;;  %v215_v14 = vld [vmem:[%s209_s11 + $0x20] sm:$0xf]  ;;  %v213_v15 = vld [vmem:[%s209_s11 + $0x10] sm:$0xff]  ;;  %v1182_v16 = vmul.f32 %v242_v11, %v1179_v13  ;;  %v267_v25 = vrot.slane %v1179_v13, 4 }
  0x1d   : > { %222 = vst [vmem:[#allocation2 + $0x20] sm:$0xf] %v215_v14  ;;  %220 = vst.msk [vmem:[#allocation2 + $0x10] sm:$0xff] %vm219_vm0, %v213_v15  ;;  %v216_v17 = vld [vmem:[%s209_s11 + $0x28] sm:$0xf]  ;;  %v1190_v29 = vrot.slane %v1174_v8, 4 }
  0x1e   : > { %224 = vst.msk [vmem:[#allocation2 + $0x28] sm:$0xf] %vm223_vm1, %v216_v17  ;;  %465 = vrot.lane.b32.xlu0 %v310_v6, %s1069_s14  ;;  %467 = vrot.lane.b32.xlu1 %v314_v10, %s1069_s14  ;;  %s877_s14 = sshll.u32 %s202_s13, 3 }
  0x22   : > { %526 = vrot.lane.b32.xlu0 %v238_v7, %s1070_s21  ;;  %528 = vrot.lane.b32.xlu1 %v242_v11, %s1070_s21  ;;  %s886_s21 = sshll.u32 %s1057_s18, 7  ;;  %s1082_s18 = smov [#allocation4]  }
  0x23   : > { %v232_v18 = vld [vmem:[#allocation2 + $0x18] sm:$0xf] }
  0x24   : > { %v247_v19 = vmul.f32 %v238_v7, %v232_v18  ;;  %v233_v20 = vld [vmem:[#allocation2 + $0x20] sm:$0xf]  ;;  %v1185_v22 = vld [vmem:[#allocation2 + $0x10] sm:$0xff]  ;;  %v256_v28 = vld [vmem:[#allocation2 + $0x18] sm:$0xf] }
  0x25   : > { %v248_v21 = vmul.f32 %v242_v11, %v233_v20  ;;  %v257_v23 = vld [vmem:[#allocation2 + $0x20] sm:$0xf]  ;;  %v268_v24 = vrot.slane %v1185_v22, 4  ;;  %v258_v27 = vld [vmem:[#allocation2 + $0x28] sm:$0xf]  ;;  %v269_v32 = vrot.slane %v256_v28, 4 }
  0x26   : > { %251 = vst [vmem:[#allocation3 + $0x10] sm:$0xf] %v247_v19  ;;  %624 = vrot.lane.b32.xlu0 %v310_v6, %s1071_s22  ;;  %626 = vrot.lane.b32.xlu1 %v314_v10, %s1071_s22  ;;  %v271_v26 = vrot.slane %v257_v23, 4  ;;  %v273_v31 = vrot.slane %v258_v27, 4  ;;  %v426_v35 = vld [vmem:[#allocation2 + $0x20] sm:$0xf] }
  0x27   : > { %252 = vst [vmem:[#allocation3 + $0x18] sm:$0xf] %v248_v21  ;;  %v270_v34 = vsel %vm265_vm2, %v1190_v29, %v269_v32  ;;  %v427_v36 = vld [vmem:[#allocation2 + $0x28] sm:$0xf]  ;;  %v425_v37 = vld [vmem:[#allocation2 + $0x18] sm:$0xf] }
  0x28   : > { %v272_v30 = vsel %vm265_vm2, %v267_v25, %v271_v26  ;;  %v274_v33 = vsel %vm265_vm2, %v268_v24, %v273_v31  ;;  %v577_v38 = vld [vmem:[#allocation2 + $0x28] sm:$0xf]  ;;  %v576_v39 = vld [vmem:[#allocation2 + $0x20] sm:$0xf]  ;;  %v303_v44 = vld [vmem:[#allocation2 + $0x18] sm:$0xf] }
  0x29   : > { %v591_v40 = vrot.slane %v577_v38, 4  ;;  %v589_v41 = vrot.slane %v576_v39, 4  ;;  %v305_v54 = vld [vmem:[#allocation2 + $0x28] sm:$0xf]  ;;  %v523_v55 = vld [vmem:[#allocation2 + $0x18] sm:$0xf] }
  0x2a   : > { %279 = vrot.lane.b32.xlu1 %v268_v24, %s1072_s24  ;;  %277 = vrot.lane.b32.xlu0 %v267_v25, %s1072_s24  ;;  %v304_v1 = vld [vmem:[#allocation2 + $0x20] sm:$0xf]  ;;  %v525_v2 = vld [vmem:[#allocation2 + $0x28] sm:$0xf]  ;;  %s204_s22 = scalar_lea.vmem [#allocation4], %s877_s14 }
  0x2b   : > { %v592_v42 = vsel %vm265_vm2, %v268_v24, %v591_v40  ;;  %v590_v43 = vsel %vm265_vm2, %v267_v25, %v589_v41  ;;  %v524_v19 = vld [vmem:[#allocation2 + $0x20] sm:$0xf] }
  0x2e   : > { %283 = vrot.lane.b32.xlu1 %v272_v30, %s1072_s24  ;;  %275 = vrot.lane.b32.xlu0 %v1190_v29, %s1072_s24 }
  0x32   : > { %285 = vrot.lane.b32.xlu0 %v274_v33, %s1072_s24  ;;  %281 = vrot.lane.b32.xlu1 %v270_v34, %s1072_s24  ;;  %v364_v33 = vld [vmem:[#allocation2 + $0x18] sm:$0xf]  ;;  %v366_v34 = vld [vmem:[#allocation2 + $0x28] sm:$0xf]  ;;  %s802_s24 = sshll.u32 %s204_s22, 4  ;;  %s1352_s24 = int_to_ptr.vmem [resolvable:$true] %s802_s24 }
  0x36   : > { %436 = vrot.lane.b32.xlu0 %v1179_v13, %s1073_s26  ;;  %438 = vrot.lane.b32.xlu1 %v1185_v22, %s1073_s26 }
  0x3a   : > { %442 = vrot.lane.b32.xlu0 %v426_v35, %s1073_s26  ;;  %444 = vrot.lane.b32.xlu1 %v427_v36, %s1073_s26 }
  0x3e   : > { %434 = vrot.lane.b32.xlu0 %v1174_v8, %s1073_s26  ;;  %440 = vrot.lane.b32.xlu1 %v425_v37, %s1073_s26 }
  0x42   : > { %597 = vrot.lane.b32.xlu0 %v268_v24, %s1074_s29  ;;  %595 = vrot.lane.b32.xlu1 %v267_v25, %s1074_s29 }
  0x46   : > { %603 = vrot.lane.b32.xlu0 %v592_v42, %s1074_s29  ;;  %601 = vrot.lane.b32.xlu1 %v590_v43, %s1074_s29 }
  0x4a   : > { %593 = vrot.lane.b32.xlu0 %v1190_v29, %s1074_s29 }
  0x88   : > { %v316_v45 = vpop.permute.xlu0 %315  ;;  %v1208_v46 = vpop.permute.xlu1 %367 }
  0x89   : > { %v327_v47 = vmul.f32 %v316_v45, %v303_v44  ;;  %v324_v53 = vmul.f32 %v316_v45, %v1174_v8  ;;  %v376_v20 = vmul.f32 %v1208_v46, %v1174_v8  ;;  %v379_v42 = vmul.f32 %v1208_v46, %v364_v33 }
  0x8b   : > { %342 = vrot.lane.b32.xlu1 %v327_v47, %s1075_s30  ;;  %v388_v35 = vrot.slane %v376_v20, 4 }
  0x8c   : > { %v318_v48 = vpop.permute.xlu0 %317  ;;  %v1211_v49 = vpop.permute.xlu1 %369 }
  0x8d   : > { %v326_v50 = vmul.f32 %v318_v48, %v1185_v22  ;;  %v329_v58 = vmul.f32 %v318_v48, %v305_v54  ;;  %v320_v60 = vsel %vm319_vm3, %v316_v45, %v318_v48  ;;  %v1237_v11 = vmul.f32 %v1211_v49, %v1185_v22  ;;  %v462_v45 = vld [vmem:[#allocation2 + $0x18] sm:$0xf] }
  0x8e   : > { %v325_v0 = vmul.f32 %v320_v60, %v1179_v13  ;;  %v328_v6 = vmul.f32 %v320_v60, %v304_v1  ;;  %v372_v31 = vsel %vm371_vm6, %v1208_v46, %v1211_v49  ;;  %v381_v43 = vmul.f32 %v1211_v49, %v366_v34  ;;  %v365_v46 = vld [vmem:[#allocation2 + $0x20] sm:$0xf] }
  0x8f   : > { %340 = vrot.lane.b32.xlu0 %v326_v50, %s1075_s30  ;;  %v390_v21 = vrot.slane %v1237_v11, 4  ;;  %v377_v40 = vmul.f32 %v372_v31, %v1179_v13  ;;  %v380_v60 = vmul.f32 %v372_v31, %v365_v46  ;;  %v622_v31 = vld [vmem:[#allocation2 + $0x20] sm:$0xf] }
  0x90   : > { %v1215_v51 = vpop.permute.xlu0 %465  ;;  %v1217_v52 = vpop.permute.xlu1 %467 }
  0x91   : > { %v1248_v25 = vmul.f32 %v1217_v52, %v1185_v22  ;;  %v474_v38 = vmul.f32 %v1215_v51, %v1174_v8  ;;  %v477_v49 = vmul.f32 %v1215_v51, %v462_v45  ;;  %v393_v11 = vrot.slane %v380_v60, 4 }
  0x93   : > { %336 = vrot.lane.b32.xlu0 %v324_v53, %s1075_s30  ;;  %v488_v39 = vrot.slane %v1248_v25, 4  ;;  %v486_v50 = vrot.slane %v474_v38, 4  ;;  %v389_v53 = vrot.slane %v377_v40, 4  ;;  %v623_v38 = vld [vmem:[#allocation2 + $0x28] sm:$0xf] }
  0x94   : > { %v527_v56 = vpop.permute.xlu0 %526  ;;  %v529_v57 = vpop.permute.xlu1 %528  ;;  %v621_v40 = vld [vmem:[#allocation2 + $0x18] sm:$0xf] }
  0x95   : > { %v538_v59 = vmul.f32 %v527_v56, %v523_v55  ;;  %v537_v61 = vmul.f32 %v529_v57, %v1185_v22  ;;  %v535_v5 = vmul.f32 %v527_v56, %v1174_v8  ;;  %v531_v9 = vsel %vm530_vm5, %v527_v56, %v529_v57 }
  0x96   : > { %v540_v10 = vmul.f32 %v529_v57, %v525_v2  ;;  %v536_v17 = vmul.f32 %v531_v9, %v1179_v13  ;;  %v539_v26 = vmul.f32 %v531_v9, %v524_v19  ;;  %v391_v55 = vrot.slane %v379_v42, 4  ;;  %v464_v57 = vld [vmem:[#allocation2 + $0x28] sm:$0xf]  ;;  %v575_v9 = vld [vmem:[#allocation2 + $0x18] sm:$0xf] }
  0x97   : > { %346 = vrot.lane.b32.xlu0 %v329_v58, %s1075_s30  ;;  %553 = vrot.lane.b32.xlu1 %v538_v59, %s1076_s5  ;;  %v395_v56 = vrot.slane %v381_v43, 4  ;;  %v489_v2 = vrot.slane %v477_v49, 4  ;;  %v394_v25 = vsel %vm265_vm2, %v389_v53, %v393_v11  ;;  %v1081_v42 = vmov 0  }
  0x98   : > { %v1224_v62 = vpop.permute.xlu0 %624  ;;  %v1226_v63 = vpop.permute.xlu1 %626  ;;  %986 = vset.pattern.permute.xlu0 %v1081_v42 }
  0x9b   : > { %551 = vrot.lane.b32.xlu0 %v537_v61, %s1076_s5  ;;  %338 = vrot.lane.b32.xlu1 %v325_v0, %s1075_s30 }
  0x9c   : > { %v280_v3 = vpop.permute.xlu1 %279  ;;  %v278_v4 = vpop.permute.xlu0 %277 }
  0x9d   : > { %v289_v7 = vsel %vm287_vm4, %v278_v4, %v280_v3  ;;  %v396_v3 = vsel %vm265_vm2, %v390_v21, %v395_v56 }
  0x9e   : > { %297 = vst [vmem:[#allocation3 + $0x18] sm:$0xf0] %v289_v7 }
  0x9f   : > { %547 = vrot.lane.b32.xlu0 %v535_v5, %s1076_s5  ;;  %344 = vrot.lane.b32.xlu1 %v328_v6, %s1075_s30  ;;  %s1350_s30 = scalar_lea.hbm %s1401_s4, %s886_s21 }
  0xa0   : > { %v284_v14 = vpop.permute.xlu1 %283  ;;  %v276_v15 = vpop.permute.xlu0 %275 }
  0xa1   : > { %v288_v18 = vsel %vm287_vm4, %v276_v15, %v278_v4  ;;  %v392_v4 = vsel %vm265_vm2, %v388_v35, %v391_v55  ;;  %v490_v15 = vsel %vm265_vm2, %v486_v50, %v489_v2 }
  0xa2   : > { %296 = vst [vmem:[#allocation3 + $0x10] sm:$0xf0] %v288_v18  ;;  %v587_v18 = vrot.slane %v575_v9, 4 }
  0xa3   : > { %557 = vrot.lane.b32.xlu0 %v540_v10, %s1076_s5  ;;  %549 = vrot.lane.b32.xlu1 %v536_v17, %s1076_s5  ;;  %v628_v17 = vsel %vm219_vm0, %v1224_v62, %v1226_v63 }
  0xa4   : > { %v286_v23 = vpop.permute.xlu0 %285  ;;  %v282_v24 = vpop.permute.xlu1 %281 }
  0xa5   : > { %v1251_v27 = vsel %vm287_vm4, %v284_v14, %v286_v23  ;;  %v1254_v28 = vsel %vm287_vm4, %v282_v24, %v284_v14  ;;  %v673_v30 = vld [vmem:[#allocation3 + $0x18] sm:$0xff] }
  0xa6   : > { %v887_v32 = vpack.c.bf16 %v673_v30, %v1182_v16  ;;  %v588_v30 = vsel %vm265_vm2, %v1190_v29, %v587_v18  ;;  %v632_v29 = vmul.f32 %v1224_v62, %v1174_v8  ;;  %v698_v8 = vld [vmem:[%s1399_s2] sm:$0xf] }
  0xa7   : > { %401 = vrot.lane.b32.xlu0 %v390_v21, %s1077_s6  ;;  %555 = vrot.lane.b32.xlu1 %v539_v26, %s1076_s5  ;;  %v633_v26 = vmul.f32 %v628_v17, %v1179_v13  ;;  %s786_s5 = scalar_lea.sflag [#allocation5], %s202_s13 }
  0xa8   : > { %v437_v36 = vpop.permute.xlu0 %436  ;;  %v439_v37 = vpop.permute.xlu1 %438  ;;  %888 = vmatprep.subr.bf16.mxu0 %v887_v32 }
  0xa9   : > { %v1266_v16 = vsel %vm446_vm7, %v437_v36, %v439_v37  ;;  %v672_v41 = vld [vmem:[#allocation3 + $0x10] sm:$0xff]  ;;  %v634_v37 = vmul.f32 %v1226_v63, %v1185_v22 }
  0xaa   : > { %v889_v44 = vpack.c.bf16 %v672_v41, %v1177_v12  ;;  %v470_v12 = vsel %vm469_vm8, %v1215_v51, %v1217_v52  ;;  %v479_v51 = vmul.f32 %v1217_v52, %v464_v57  ;;  %v463_v52 = vld [vmem:[#allocation2 + $0x20] sm:$0xf]  ;;  %v635_v41 = vmul.f32 %v1224_v62, %v621_v40 }
  0xab   : > { %397 = vrot.lane.b32.xlu0 %v388_v35, %s1077_s6  ;;  %499 = vrot.lane.b32.xlu1 %v488_v39, %s1078_s7  ;;  %v475_v61 = vmul.f32 %v470_v12, %v1179_v13  ;;  %v478_v23 = vmul.f32 %v470_v12, %v463_v52  ;;  %v636_v35 = vmul.f32 %v628_v17, %v622_v31 }
  0xac   : > { %v443_v47 = vpop.permute.xlu0 %442  ;;  %v445_v48 = vpop.permute.xlu1 %444  ;;  %890 = vmatpush1.bf16.msra.mxu0 %v889_v44  ;;  %v493_v14 = vrot.slane %v479_v51, 4 }
  0xad   : > { %v450_v54 = vsel %vm446_vm7, %v443_v47, %v445_v48  ;;  %v487_v7 = vrot.slane %v475_v61, 4  ;;  %v491_v34 = vrot.slane %v478_v23, 4 }
  0xae   : > { %458 = vst [vmem:[#allocation3 + $0x78] sm:$0xf] %v450_v54  ;;  %v494_v24 = vsel %vm265_vm2, %v488_v39, %v493_v14  ;;  %v637_v39 = vmul.f32 %v1226_v63, %v623_v38 }
  0xaf   : > { %495 = vrot.lane.b32.xlu0 %v486_v50, %s1078_s7  ;;  %399 = vrot.lane.b32.xlu1 %v389_v53, %s1077_s6  ;;  %v492_v13 = vsel %vm265_vm2, %v487_v7, %v491_v34 }
  0xb0   : > { %v435_v58 = vpop.permute.xlu0 %434  ;;  %v441_v59 = vpop.permute.xlu1 %440 }
  0xb1   : > { %v1281_v0 = vsel %vm446_vm7, %v435_v58, %v437_v36  ;;  %v449_v1 = vsel %vm446_vm7, %v441_v59, %v443_v47  ;;  %v1080_v36 = vmov 0.0  }
  0xb2   : > { %457 = vst [vmem:[#allocation3 + $0x70] sm:$0xf] %v449_v1  ;;  %226 = vst [vmem:[#allocation3 + $0xd8] sm:$0xf0] %v1080_v36  ;;  %771 = vmatprep.mubr.f32.mxu0 %v1080_v36 }
  0xb3   : > { %407 = vrot.lane.b32.xlu0 %v396_v3, %s1077_s6  ;;  %403 = vrot.lane.b32.xlu1 %v392_v4, %s1077_s6  ;;  %225 = vst [vmem:[#allocation3 + $0xd0] sm:$0xf0] %v1080_v36 }
  0xb4   : > { %v598_v5 = vpop.permute.xlu0 %597  ;;  %v596_v6 = vpop.permute.xlu1 %595 }
  0xb5   : > { %v607_v10 = vsel %vm605_vm9, %v596_v6, %v598_v5 }
  0xb6   : > { %615 = vst [vmem:[#allocation3 + $0xa8] sm:$0xf0] %v607_v10 }
  0xb7   : > { %497 = vrot.lane.b32.xlu0 %v487_v7, %s1078_s7  ;;  %501 = vrot.lane.b32.xlu1 %v490_v15, %s1078_s7 }
  0xb8   : > { %v604_v19 = vpop.permute.xlu0 %603  ;;  %v1296_v20 = vpop.permute.xlu1 %601 }
  0xb9   : > { %v1300_v21 = vsel %vm605_vm9, %v1296_v20, %v604_v19 }
  0xbb   : > { %505 = vrot.lane.b32.xlu0 %v494_v24, %s1078_s7  ;;  %405 = vrot.lane.b32.xlu1 %v394_v25, %s1077_s6  ;;  %s987_s6 = scalar_lea.vmem %s1352_s24, 128 }
  0xbc   : > { %v594_v32 = vpop.permute.xlu0 %593  ;;  %p988_p12 = scmp.ne.s32.totalorder %s1352_s24, %s987_s6 }
  0xbd   : > { %v606_v33 = vsel %vm605_vm9, %v594_v32, %v596_v6 }
  0xbe   : > { %614 = vst [vmem:[#allocation3 + $0xa0] sm:$0xf0] %v606_v33  ;;  %p989_p13 = pnand %p988_p12, %p1148_p4 }
  0xbf   : > { %646 = vrot.lane.b32.xlu0 %v633_v26, %s1079_s8  ;;  %599 = vrot.lane.b32.xlu1 %v588_v30, %s1074_s29 }
  0xc0   : > { %p990_p0 = pneg %p989_p13 }
  0xc3   : > { %652 = vrot.lane.b32.xlu0 %v636_v35, %s1079_s8  ;;  %503 = vrot.lane.b32.xlu1 %v492_v13, %s1078_s7  ;;  %s991_s7 = sshll.u32 %s1082_s18, 4  ;;  %s992_s7 = int_to_ptr.vmem [resolvable:$false] %s991_s7 }
  0xc4   : > { %p994_p1 = scmp.lt.s32.totalorder %s1352_s24, %s992_s7 }
  0xc7   : > { %644 = vrot.lane.b32.xlu0 %v632_v29, %s1079_s8  ;;  %648 = vrot.lane.b32.xlu1 %v634_v37, %s1079_s8 }
  0xcb   : > { %654 = vrot.lane.b32.xlu1 %v637_v39, %s1079_s8  ;;  %701 = vperm.xlu0 %986, %v698_v8  }
  0xcf   : > { %650 = vrot.lane.b32.xlu1 %v635_v41, %s1079_s8  ;;  %s993_s8 = scalar_lea.vmem %s992_s7, 256 }
  0xd0   : > { %p995_p2 = scmp.lt.s32.totalorder %s993_s8, %s987_s6 }
  0xd2   : > { %p996_p3 = por %p995_p2, %p994_p1 }
  0xd4   : > { %p997_p5 = pnand %p996_p3, %p990_p0 }
  0xfd   : > { %v343_v43 = vpop.permute.xlu1 %342 }
 0x101   : > { %v341_v22 = vpop.permute.xlu0 %340 }
 0x105   : > { %v337_v44 = vpop.permute.xlu0 %336 }
 0x109   : > { %v347_v45 = vpop.permute.xlu0 %346  ;;  %v554_v47 = vpop.permute.xlu1 %553 }
 0x10d   : > { %v552_v48 = vpop.permute.xlu0 %551  ;;  %v339_v63 = vpop.permute.xlu1 %338 }
 0x10e   : > { %v349_v50 = vsel %vm348_vm10, %v337_v44, %v339_v63  ;;  %v350_v53 = vsel %vm348_vm10, %v339_v63, %v341_v22 }
 0x10f   : > { %v891_v62 = vpack.c.bf16 %v350_v53, %v1251_v27  ;;  %v893_v54 = vpack.c.bf16 %v349_v50, %v1254_v28  ;;  %v669_v53 = vld [vmem:[%s1398_s1] sm:$0xf] }
 0x111   : > { %v548_v55 = vpop.permute.xlu0 %547  ;;  %v345_v46 = vpop.permute.xlu1 %344  ;;  %892 = vmatprep.subr.bf16.mxu0 %v891_v62 }
 0x112   : > { %v351_v56 = vsel %vm348_vm10, %v343_v43, %v345_v46  ;;  %v352_v49 = vsel %vm348_vm10, %v345_v46, %v347_v45  ;;  %894 = vmatpush1.bf16.msra.mxu0 %v893_v54 }
 0x113   : > { %359 = vst [vmem:[#allocation3 + $0x40] sm:$0xf] %v351_v56  ;;  %360 = vst [vmem:[#allocation3 + $0x48] sm:$0xf] %v352_v49 }
 0x115   : > { %v558_v12 = vpop.permute.xlu0 %557  ;;  %v550_v57 = vpop.permute.xlu1 %549 }
 0x116   : > { %v560_v58 = vsel %vm559_vm11, %v548_v55, %v550_v57  ;;  %v561_v59 = vsel %vm559_vm11, %v550_v57, %v552_v48 }
 0x119   : > { %v402_v60 = vpop.permute.xlu0 %401  ;;  %v556_v61 = vpop.permute.xlu1 %555 }
 0x11a   : > { %v562_v1 = vsel %vm559_vm11, %v554_v47, %v556_v61  ;;  %v563_v2 = vsel %vm559_vm11, %v556_v61, %v558_v12 }
 0x11b   : > { %570 = vst [vmem:[#allocation3 + $0xa0] sm:$0xf] %v562_v1  ;;  %571 = vst [vmem:[#allocation3 + $0xa8] sm:$0xf] %v563_v2 }
 0x11d   : > { %v398_v27 = vpop.permute.xlu0 %397  ;;  %v500_v28 = vpop.permute.xlu1 %499 }
 0x121   : > { %v496_v51 = vpop.permute.xlu0 %495  ;;  %v400_v3 = vpop.permute.xlu1 %399 }
 0x122   : > { %v410_v4 = vsel %vm409_vm12, %v398_v27, %v400_v3  ;;  %v411_v5 = vsel %vm409_vm12, %v400_v3, %v402_v60  ;;  %v691_v38 = vld [vmem:[#allocation3 + $0xa8] sm:$0xff]  ;;  %v690_v42 = vld [vmem:[#allocation3 + $0xa0] sm:$0xff] }
 0x123   : > { %418 = vst [vmem:[#allocation3 + $0x40] sm:$0xf0] %v410_v4  ;;  %419 = vst [vmem:[#allocation3 + $0x48] sm:$0xf0] %v411_v5  ;;  %v907_v8 = vpack.c.bf16 %v1300_v21, %v691_v38 }
 0x125   : > { %v408_v6 = vpop.permute.xlu0 %407  ;;  %v404_v7 = vpop.permute.xlu1 %403 }
 0x129   : > { %v498_v9 = vpop.permute.xlu0 %497  ;;  %v502_v10 = vpop.permute.xlu1 %501 }
 0x12a   : > { %v508_v11 = vsel %vm507_vm13, %v496_v51, %v498_v9  ;;  %v509_v14 = vsel %vm507_vm13, %v498_v9, %v500_v28  ;;  %v679_v19 = vld [vmem:[#allocation3 + $0x48] sm:$0xff]  ;;  %v678_v23 = vld [vmem:[#allocation3 + $0x40] sm:$0xff] }
 0x12b   : > { %516 = vst [vmem:[#allocation3 + $0x70] sm:$0xf0] %v508_v11  ;;  %517 = vst [vmem:[#allocation3 + $0x78] sm:$0xf0] %v509_v14 }
 0x12d   : > { %v506_v15 = vpop.permute.xlu0 %505  ;;  %v406_v52 = vpop.permute.xlu1 %405 }
 0x12e   : > { %v412_v17 = vsel %vm409_vm12, %v404_v7, %v406_v52  ;;  %v413_v18 = vsel %vm409_vm12, %v406_v52, %v408_v6 }
 0x12f   : > { %v895_v24 = vpack.c.bf16 %v413_v18, %v679_v19  ;;  %v897_v25 = vpack.c.bf16 %v412_v17, %v678_v23 }
 0x131   : > { %v647_v26 = vpop.permute.xlu0 %646  ;;  %v600_v30 = vpop.permute.xlu1 %599  ;;  %896 = vmatprep.subr.bf16.mxu0 %v895_v24 }
 0x132   : > { %v608_v31 = vsel %vm605_vm9, %v600_v30, %v1296_v20  ;;  %898 = vmatpush1.bf16.msra.mxu0 %v897_v25  ;;  %v685_v32 = vld [vmem:[#allocation3 + $0x78] sm:$0xff]  ;;  %v684_v33 = vld [vmem:[#allocation3 + $0x70] sm:$0xff] }
 0x133   : > { %v899_v34 = vpack.c.bf16 %v685_v32, %v1266_v16  ;;  %v901_v35 = vpack.c.bf16 %v684_v33, %v1281_v0  ;;  %v909_v22 = vpack.c.bf16 %v608_v31, %v690_v42 }
 0x135   : > { %v653_v36 = vpop.permute.xlu0 %652  ;;  %v504_v13 = vpop.permute.xlu1 %503  ;;  %900 = vmatprep.subr.bf16.mxu0 %v899_v34 }
 0x136   : > { %v510_v29 = vsel %vm507_vm13, %v502_v10, %v504_v13  ;;  %v511_v37 = vsel %vm507_vm13, %v504_v13, %v506_v15  ;;  %902 = vmatpush1.bf16.msra.mxu0 %v901_v35 }
 0x137   : > { %v903_v39 = vpack.c.bf16 %v561_v59, %v511_v37  ;;  %v905_v40 = vpack.c.bf16 %v560_v58, %v510_v29 }
 0x139   : > { %v645_v20 = vpop.permute.xlu0 %644  ;;  %v649_v41 = vpop.permute.xlu1 %648  ;;  %904 = vmatprep.subr.bf16.mxu0 %v903_v39 }
 0x13a   : > { %v657_v16 = vsel %vm656_vm14, %v645_v20, %v647_v26  ;;  %v658_v0 = vsel %vm656_vm14, %v647_v26, %v649_v41  ;;  %906 = vmatpush1.bf16.msra.mxu0 %v905_v40 }
 0x13b   : > { %908 = vmatprep.subr.bf16.mxu0 %v907_v8 }
 0x13d   : > { %v655_v43 = vpop.permute.xlu1 %654 }
 0x13e   : > { %v660_v44 = vsel %vm656_vm14, %v653_v36, %v655_v43  ;;  %910 = vmatpush1.bf16.msra.mxu0 %v909_v22 }
 0x13f   : > { %668 = vst [vmem:[#allocation3 + $0xd8] sm:$0xf] %v660_v44 }
 0x141   : > { %v651_v45 = vpop.permute.xlu1 %650 }
 0x142   : > { %v659_v47 = vsel %vm656_vm14, %v651_v45, %v653_v36 }
 0x143   : > { %667 = vst [vmem:[#allocation3 + $0xd0] sm:$0xf] %v659_v47 }
 0x146   : > { %v697_v48 = vld [vmem:[#allocation3 + $0xd8] sm:$0xff] }
 0x147   : > { %v911_v21 = vpack.c.bf16 %v697_v48, %v658_v0 }
 0x149   : > { %912 = vmatprep.subr.bf16.mxu0 %v911_v21 }
 0x14a   : > { %v696_v63 = vld [vmem:[#allocation3 + $0xd0] sm:$0xff]  ;;  %v702_v62 = vpop.permute.xlu0 %701 }
 0x14b   : > { %v913_v50 = vpack.c.bf16 %v696_v63, %v657_v16 }
 0x14d   : > { %914 = vmatpush1.bf16.msra.mxu0 %v913_v50 }
 0x150   : > { %880 = vmatmul.mubr.msk.f32.vlgmr.msra.gmra.mrb[0].mxu0 %vm409_vm12, %v669_v53 }
 0x223   : > { %v773_v54 = vpop.f32.mrb[0].mxu0 }
 0x224   : > { %v774_v55 = vadd.f32 %v773_v54, %v702_v62  ;;  %v775_v46 = vpop.f32.mrb[1].mxu0 }
 0x225   : > { %v776_v56 = vadd.f32 %v775_v46, %v702_v62 }
 0x226   : > { %v778_v49 = vmax.f32 %v774_v55, 0.0 }
 0x227   : > { %v779_v12 = vmax.f32 %v776_v56, 0.0 }
 0x229   : > { %v782_v57 = vcombine.low %v778_v49, %v779_v12 }
 0x22b   : > { %784 = vst [vmem:[%s204_s22] sm:$0xff] %v782_v57 }
 0x22c   : > { %1000 = shalt.err (!%p997_p5)
}
 0x22d   : > { %s1001_s9 = scalar_lea.hbm %s1350_s30, 128  ;;  %s1005_s12 = scalar_lea.hbm %s1401_s4, 256 }
 0x22e   : > { %p1002_p6 = scmp.ne.s32.totalorder %s1350_s30, %s1001_s9  ;;  %p1006_p10 = scmp.lt.u32.totalorder %s1350_s30, %s1401_s4 }
 0x22f   : > { %p1007_p11 = scmp.lt.u32.totalorder %s1005_s12, %s1001_s9  ;;  %p1009_p13 = scmp.lt.u32.totalorder %s1001_s9, %s1350_s30 }
 0x230   : > { %p1003_p7 = pnand %p1002_p6, %p1148_p4 }
 0x231   : > { %p1008_p12 = por %p1007_p11, %p1006_p10 }
 0x232   : > { %p1004_p9 = pneg %p1003_p7 }
 0x233   : > { %p1010_p0 = por %p1009_p13, %p1008_p12 }
 0x235   : > { %p1011_p1 = pnand %p1010_p0, %p1004_p9 }
 0x237   : > { %1014 = shalt.err (!%p1011_p1)
}
 0x238   : > { %916 = dma.vmem_to_hbm [thread:$0]  (%p1148_p4), %s1352_s24, 128, %s1350_s30, %s786_s5  }
 0x239 PF: > { %p922_p2 = scmp.ge.s32.totalorder %s1065_s20, 2  ;;  %s814_s21 = sand.u32 1, %s1045_s15  }
 0x23a   : > { %s815_s22 = scalar_lea.sflag [#allocation5], %s814_s21 }
 0x23b   : > { %p919_p3 = pnand %p922_p2, %p1155_p8 }
 0x23d   : > { %1040 = dma.done.wait (!%p919_p3), %s815_s22, 128  }
 0x23e   : > { %1042 = vsyncadd (!%p919_p3), %s815_s22, 4294967168  ;;  %s17_s20 = sadd.s32 1, %s1065_s20   ;;  %s1404_s15 = smov %s1049_s16 }
 0x23f   : > { %p14_p5 = scmp.ge.s32.totalorder %s17_s20, 4   ;;  %s1405_s16 = smov %s1053_s17 }
 0x240   : > { %s1406_s17 = smov %s1161_s28  ;;  %s1407_s18 = smov %s1061_s19 }
 0x241   : > { %s1408_s19 = smov %s1410_s23  ;;  %16 = sbr.rel (!%p14_p5) target bundleno = 4 (0x4), region = 72 }
 0x248   :  { %820 = vsyncpa [#allocation5], 1 }
 0x249   :  { %822 = vsyncpa [#allocation5 + $0x1], 1 }

</bundles_post_ra>
